<compile_context>
chip_gen: v7x
topology: tpu7x:2x2x1
jax: 0.10.0
libtpu: 0.0.40
codegen_flags: <defaults>
</compile_context>

<pallas_src>
import jax
import jax.numpy as jnp
import numpy as np
from jax import lax
from jax.experimental import pallas as pl
from jax.experimental.pallas import tpu as pltpu


def _round_up(x, m):
    return ((x + m - 1) // m) * m


def _pick_tile(n):
    """Largest power-of-two column tile (<=512) that divides N; else full N."""
    for c in (512, 256, 128, 64, 32, 16, 8):
        if c <= n and n % c == 0:
            return c
    return n


def make_diffusion_kernel(tau, lambda_reg, n_nodes, hidden_dim, hp, tk):
    inv_nh = 1.0 / float(n_nodes * hidden_dim)   # mse uses the ORIGINAL hidden dim
    inv_nn = 1.0 / float(n_nodes * n_nodes)
    nt = n_nodes // tk
    f32 = jnp.float32
    bf16 = jnp.bfloat16

    def kernel(z0_ref, w1_ref, b1_ref, w2_ref, b2_ref,        # inputs
               z_ref, energy_ref,                             # outputs
               t_ref, acc_ref, m_ref, l_ref, racc_ref, eacc_ref):  # scratch
        layer = pl.program_id(0)
        last = pl.num_programs(0) - 1

        # ---- state init at first grid step (Z carry lives in the resident output) ----
        @pl.when(layer == 0)
        def _init():
            z_ref[...] = z0_ref[...]
            eacc_ref[...] = jnp.zeros_like(eacc_ref)

        Z = z_ref[...]                                        # (N, Hp) f32

        # ---- diffusivity transform: Linear -> ReLU -> Linear (f32, O(N*Hp^2)) ----
        h = jnp.dot(Z, w1_ref[...], preferred_element_type=f32) + b1_ref[...]
        h = jnp.maximum(h, 0.0)
        T = jnp.dot(h, w2_ref[...], preferred_element_type=f32) + b2_ref[...]
        t_ref[...] = T.astype(bf16)                           # bf16 MXU operand

        # ---- phase 1: Z_prop = softmax(T T^T, dim=1) @ Z, online over column tiles ----
        m_ref[...] = jnp.full_like(m_ref, -jnp.inf)           # running row max
        l_ref[...] = jnp.zeros_like(l_ref)                    # running denominator
        acc_ref[...] = jnp.zeros_like(acc_ref)                # running P @ Z

        @pl.loop(0, nt)
        def _prop(kt):
            start = pl.multiple_of(kt * tk, tk)
            t_q = t_ref[...]                                  # (N, Hp)  bf16
            t_k = t_ref[pl.ds(start, tk), :]                  # (TK, Hp) bf16
            z_k = z_ref[pl.ds(start, tk), :].astype(bf16)     # (TK, Hp) bf16
            s = lax.dot_general(t_q, t_k, (((1,), (1,)), ((), ())),
                                preferred_element_type=f32)   # (N, TK)
            m_prev = m_ref[...]
            m_new = jnp.maximum(m_prev, jnp.max(s, axis=1, keepdims=True))
            alpha = jnp.exp(m_prev - m_new)
            p = jnp.exp(s - m_new)
            l_ref[...] = alpha * l_ref[...] + jnp.sum(p, axis=1, keepdims=True)
            acc_ref[...] = alpha * acc_ref[...] + jnp.dot(
                p.astype(bf16), z_k, preferred_element_type=f32)
            m_ref[...] = m_new

        # normalization on the EUP (reciprocal + multiply instead of N^2-wide divide)
        z_prop = acc_ref[...] * pl.reciprocal(l_ref[...], approx=True)
        z_next = Z + tau * (z_prop - Z)
        z_ref[...] = z_next

        # ---- energy: mse(Z, Z_init) + lambda * mean(log(1 + cdist(Z, Z))) ----
        diff = z_next - z0_ref[...]
        recon = jnp.sum(jnp.sum(diff * diff, axis=1, keepdims=True),
                        axis=0, keepdims=True)                # (1, 1)

        zb = z_next.astype(bf16)
        t_ref[...] = zb                                       # reuse bf16 scratch
        zf = zb.astype(f32)
        # direct row norms (O(N*Hp) VPU) — replaces the iota/mask gram-diagonal trick
        m_ref[...] = jnp.sum(zf * zf, axis=1, keepdims=True)  # (N, 1) ||z_i||^2
        racc_ref[...] = jnp.zeros_like(racc_ref)

        @pl.loop(0, nt)
        def _reg(kt):
            start = pl.multiple_of(kt * tk, tk)
            zb_k = t_ref[pl.ds(start, tk), :]                 # (TK, Hp) bf16
            gram_k = lax.dot_general(t_ref[...], zb_k, (((1,), (1,)), ((), ())),
                                     preferred_element_type=f32)   # (N, TK)
            zf_k = zb_k.astype(f32)
            # column norms of this tile via a tiny ones-vector matmul -> (1, TK)
            sq_col = lax.dot_general(jnp.ones((1, hp), f32), zf_k * zf_k,
                                     (((1,), (1,)), ((), ())),
                                     preferred_element_type=f32)
            d2 = m_ref[...] + sq_col - 2.0 * gram_k
            d = jnp.sqrt(jnp.maximum(d2, 0.0))
            lg = jnp.log(1.0 + d)
            racc_ref[...] = racc_ref[...] + jnp.sum(
                jnp.sum(lg, axis=1, keepdims=True), axis=0, keepdims=True)

        eacc_ref[...] = (eacc_ref[...] + inv_nh * recon
                         + (lambda_reg * inv_nn) * racc_ref[...])

        # ---- write the energy output once, at the last grid step ----
        @pl.when(layer == last)
        def _finalize():
            energy_ref[...] = eacc_ref[...]

    return kernel


def _vmem_limit_bytes(n, hp, tk):
    f32 = 4
    resident = 2 * n * hp * f32 + f32                         # Z0 + Z_out + energy blocks
    weights = 2 * 2 * (hp * hp + hp) * f32                    # W1/W2 (+biases) double-buffered
    scratch = n * hp * 2 + n * hp * f32 + 2 * n * f32 + 2 * f32
    temps = 8 * n * tk * f32 + 4 * n * hp * f32               # in-flight [N, TK] tiles + values
    est = 2 * (resident + weights + scratch + temps)          # 2x headroom
    return int(min(max(est, 32 * 1024 * 1024), 64 * 1024 * 1024))


def diffusion_model_forward(X, params, *, tau=0.1, lambda_reg=1.0):
    Win, bin_, W1s, b1s, W2s, b2s, Wout, bout = params
    N = X.shape[0]
    H = Win.shape[1]
    L = W1s.shape[0]

    Hp = _round_up(H, 128)
    ph = Hp - H
    TK = _pick_tile(N)

    # --- input projection in plain XLA, then zero-pad hidden dim to Hp (exact) ---
    Z0 = jnp.dot(X.astype(jnp.float32), Win) + bin_           # (N, H)
    Z0p = jnp.pad(Z0, ((0, 0), (0, ph)))
    W1p = jnp.pad(W1s, ((0, 0), (0, ph), (0, ph)))
    b1p = jnp.pad(b1s, ((0, 0), (0, 0), (0, ph)))
    W2p = jnp.pad(W2s, ((0, 0), (0, ph), (0, ph)))
    b2p = jnp.pad(b2s, ((0, 0), (0, 0), (0, ph)))

    kernel = make_diffusion_kernel(tau, lambda_reg, N, H, Hp, TK)

    # None in block_shape squeezes the per-layer leading dim out of the kernel refs
    # (same effect as pl.Squeezed()): kernel sees plain 2-D weight tiles.
    grid_spec = pltpu.PrefetchScalarGridSpec(
        num_scalar_prefetch=0,
        grid=(L,),
        in_specs=[
            pl.BlockSpec((N, Hp), lambda l: (0, 0)),              # Z0 (resident)
            pl.BlockSpec((None, Hp, Hp), lambda l: (l, 0, 0)),    # W1 per layer
            pl.BlockSpec((None, 1, Hp), lambda l: (l, 0, 0)),     # b1 per layer
            pl.BlockSpec((None, Hp, Hp), lambda l: (l, 0, 0)),    # W2 per layer
            pl.BlockSpec((None, 1, Hp), lambda l: (l, 0, 0)),     # b2 per layer
        ],
        out_specs=(
            pl.BlockSpec((N, Hp), lambda l: (0, 0)),              # Z carry / final state
            pl.BlockSpec((1, 1), lambda l: (0, 0)),               # energy
        ),
        scratch_shapes=[
            pltpu.VMEM((N, Hp), jnp.bfloat16),   # T, then bf16(Z_next)
            pltpu.VMEM((N, Hp), jnp.float32),    # online-softmax P@Z accumulator
            pltpu.VMEM((N, 1), jnp.float32),     # running max / row norms
            pltpu.VMEM((N, 1), jnp.float32),     # running softmax denominator
            pltpu.VMEM((1, 1), jnp.float32),     # per-layer regularizer accumulator
            pltpu.VMEM((1, 1), jnp.float32),     # energy accumulator
        ],
    )

    flops = int(L * (4 * N * Hp * Hp + 6 * N * N * Hp))
    transcendentals = int(L * 3 * N * N)
    bytes_accessed = int(L * 4 * (2 * Hp * Hp + 2 * Hp) + 4 * (2 * N * Hp + 1))

    z_final, energy = pl.pallas_call(
        kernel,
        out_shape=(jax.ShapeDtypeStruct((N, Hp), jnp.float32),
                   jax.ShapeDtypeStruct((1, 1), jnp.float32)),
        grid_spec=grid_spec,
        compiler_params=pltpu.CompilerParams(
            dimension_semantics=("arbitrary",),
            vmem_limit_bytes=_vmem_limit_bytes(N, Hp, TK)),
        cost_estimate=pl.CostEstimate(flops=flops,
                                      transcendentals=transcendentals,
                                      bytes_accessed=bytes_accessed),
    )(Z0p, W1p, b1p, W2p, b2p)

    # --- output projection in plain XLA ---
    logits = jnp.dot(z_final[:, :H], Wout) + bout
    return logits, energy[0, 0]


# ---------------- parameter init (deterministic, nn.Linear-style) ----------
def _linear_init(key, fan_in, fan_out):
    kw, kb = jax.random.split(key)
    bound = 1.0 / np.sqrt(fan_in)
    W = jax.random.uniform(kw, (fan_in, fan_out), jnp.float32, -bound, bound)
    b = jax.random.uniform(kb, (1, fan_out), jnp.float32, -bound, bound)
    return W, b


def init_params(key, input_dim, hidden_dim, num_classes, num_layers):
    keys = jax.random.split(key, 2 + 2 * num_layers)
    Win, bin_ = _linear_init(keys[0], input_dim, hidden_dim)
    Wout, bout = _linear_init(keys[1], hidden_dim, num_classes)
    W1s, b1s, W2s, b2s = [], [], [], []
    for li in range(num_layers):
        w1, b1 = _linear_init(keys[2 + 2 * li], hidden_dim, hidden_dim)
        w2, b2 = _linear_init(keys[3 + 2 * li], hidden_dim, hidden_dim)
        W1s.append(w1); b1s.append(b1); W2s.append(w2); b2s.append(b2)
    return (Win, bin_,
            jnp.stack(W1s), jnp.stack(b1s),
            jnp.stack(W2s), jnp.stack(b2s),
            Wout, bout)


# ---------------- pure-JAX reference for correctness check -----------------
def reference_forward(X, params, tau, lambda_reg):
    Win, bin_, W1s, b1s, W2s, b2s, Wout, bout = params
    Z = X @ Win + bin_
    Z_init = Z
    energy = jnp.float32(0.0)
    for l in range(W1s.shape[0]):
        h = jnp.maximum(Z @ W1s[l] + b1s[l], 0.0)
        T = h @ W2s[l] + b2s[l]
        S = jax.nn.softmax(T @ T.T, axis=1)
        Z = Z + tau * (S @ Z - Z)
        recon = jnp.mean((Z - Z_init) ** 2)
        sq = jnp.sum(Z * Z, axis=1, keepdims=True)
        d2 = sq + sq.T - 2.0 * (Z @ Z.T)
        d = jnp.sqrt(jnp.maximum(d2, 0.0))
        energy = energy + recon + lambda_reg * jnp.mean(jnp.log(1.0 + d))
    logits = Z @ Wout + bout
    return logits, energy


if __name__ == "__main__":
    N, Din, H, C, L = 8, 16, 32, 4, 2
    tau, lam = 0.1, 1.0

    key = jax.random.PRNGKey(0)
    kx, kp = jax.random.split(key)
    X = jax.random.normal(kx, (N, Din), jnp.float32)
    params = init_params(kp, Din, H, C, L)

    logits, energy = diffusion_model_forward(X, params, tau=tau, lambda_reg=lam)
    logits, energy = jax.block_until_ready((logits, energy))

    ref_logits, ref_energy = reference_forward(X, params, tau, lam)
    # bf16 MXU operands + approximate reciprocal -> relaxed tolerance vs. f32 reference.
    assert np.allclose(np.asarray(logits), np.asarray(ref_logits),
                       rtol=2e-2, atol=2e-2), "logits mismatch"
    assert np.allclose(float(energy), float(ref_energy),
                       rtol=2e-2, atol=2e-2), "energy mismatch"

    print("KERNEL_OK")
</pallas_src>

<mosaic_0001>
module attributes {stable_mosaic.version = 11 : i64} {
  func.func @kernel(%arg0: i32, %arg1: memref<8x128xf32, #tpu.memory_space<vmem>>, %arg2: memref<1x128x128xf32, #tpu.memory_space<vmem>>, %arg3: memref<1x1x128xf32, #tpu.memory_space<vmem>>, %arg4: memref<1x128x128xf32, #tpu.memory_space<vmem>>, %arg5: memref<1x1x128xf32, #tpu.memory_space<vmem>>, %arg6: memref<8x128xf32, #tpu.memory_space<vmem>>, %arg7: memref<1x1xf32, #tpu.memory_space<vmem>>, %arg8: memref<8x128xbf16, #tpu.memory_space<vmem>>, %arg9: memref<8x128xf32, #tpu.memory_space<vmem>>, %arg10: memref<8x1xf32, #tpu.memory_space<vmem>>, %arg11: memref<8x1xf32, #tpu.memory_space<vmem>>, %arg12: memref<1x1xf32, #tpu.memory_space<vmem>>, %arg13: memref<1x1xf32, #tpu.memory_space<vmem>>) attributes {dimension_semantics = [#tpu.dimension_semantics<arbitrary>], iteration_bounds = array<i64: 2>, scalar_prefetch = 0 : i64, scratch_operands = 6 : i64, tpu.core_type = #tpu.core_type<tc>, window_params = [{pipeline_mode = #tpu.pipeline_mode<synchronous>, transform_indices = @transform_0, window_bounds = array<i64: 8, 128>}, {transform_indices = @transform_1, window_bounds = array<i64: 1, 128, 128>}, {transform_indices = @transform_2, window_bounds = array<i64: 1, 1, 128>}, {transform_indices = @transform_3, window_bounds = array<i64: 1, 128, 128>}, {transform_indices = @transform_4, window_bounds = array<i64: 1, 1, 128>}, {pipeline_mode = #tpu.pipeline_mode<synchronous>, transform_indices = @transform_5, window_bounds = array<i64: 8, 128>}, {pipeline_mode = #tpu.pipeline_mode<synchronous>, transform_indices = @transform_6, window_bounds = array<i64: 1, 1>}]} {
    %c0_i32 = arith.constant 0 : i32
    %0 = arith.cmpi eq, %arg0, %c0_i32 : i32
    %1 = arith.extui %0 : i1 to i32
    %c0_i32_0 = arith.constant 0 : i32
    %2 = arith.cmpi ne, %1, %c0_i32_0 : i32
    scf.if %2 {
      %c0_101 = arith.constant 0 : index
      %c0_102 = arith.constant 0 : index
      %132 = vector.load %arg1[%c0_101, %c0_102] : memref<8x128xf32, #tpu.memory_space<vmem>>, vector<8x128xf32>
      %c0_103 = arith.constant 0 : index
      %c0_104 = arith.constant 0 : index
      %133 = vector.load %arg6[%c0_103, %c0_104] : memref<8x128xf32, #tpu.memory_space<vmem>>, vector<8x128xf32>
      tpu.vector_store %arg6[%c0_103, %c0_104], %132 {strides = array<i32>} : memref<8x128xf32, #tpu.memory_space<vmem>>, vector<8x128xf32>,
      %cst_105 = arith.constant 0.000000e+00 : f32
      %134 = vector.broadcast %cst_105 : f32 to vector<1x1xf32>
      %c0_106 = arith.constant 0 : index
      %c0_107 = arith.constant 0 : index
      %135 = vector.load %arg13[%c0_106, %c0_107] : memref<1x1xf32, #tpu.memory_space<vmem>>, vector<1x1xf32>
      tpu.vector_store %arg13[%c0_106, %c0_107], %134 {strides = array<i32>} : memref<1x1xf32, #tpu.memory_space<vmem>>, vector<1x1xf32>,
    } else {
    }
    %c0 = arith.constant 0 : index
    %c0_1 = arith.constant 0 : index
    %3 = vector.load %arg6[%c0, %c0_1] : memref<8x128xf32, #tpu.memory_space<vmem>>, vector<8x128xf32>
    %c0_2 = arith.constant 0 : index
    %c0_3 = arith.constant 0 : index
    %c0_4 = arith.constant 0 : index
    %4 = vector.load %arg2[%c0_2, %c0_3, %c0_4] : memref<1x128x128xf32, #tpu.memory_space<vmem>>, vector<1x128x128xf32>
    %5 = vector.shape_cast %4 : vector<1x128x128xf32> to vector<128x128xf32>
    %cst = arith.constant dense<0.000000e+00> : vector<8x128xf32>
    %6 = tpu.matmul %3, %5, %cst {dimension_numbers = #tpu.dot_dimension_numbers<[1], [0], [0], [1], [0, 0, 1, 1], [], []>} : vector<8x128xf32>, vector<128x128xf32>, vector<8x128xf32> -> vector<8x128xf32>
    %c0_5 = arith.constant 0 : index
    %c0_6 = arith.constant 0 : index
    %c0_7 = arith.constant 0 : index
    %7 = vector.load %arg3[%c0_5, %c0_6, %c0_7] : memref<1x1x128xf32, #tpu.memory_space<vmem>>, vector<1x1x128xf32>
    %8 = vector.shape_cast %7 : vector<1x1x128xf32> to vector<1x128xf32>
    %9 = vector.broadcast %8 : vector<1x128xf32> to vector<8x128xf32>
    %10 = arith.addf %6, %9 : vector<8x128xf32>
    %cst_8 = arith.constant 0.000000e+00 : f32
    %11 = vector.broadcast %cst_8 : f32 to vector<8x128xf32>
    %12 = arith.maximumf %10, %11 : vector<8x128xf32>
    %c0_9 = arith.constant 0 : index
    %c0_10 = arith.constant 0 : index
    %c0_11 = arith.constant 0 : index
    %13 = vector.load %arg4[%c0_9, %c0_10, %c0_11] : memref<1x128x128xf32, #tpu.memory_space<vmem>>, vector<1x128x128xf32>
    %14 = vector.shape_cast %13 : vector<1x128x128xf32> to vector<128x128xf32>
    %cst_12 = arith.constant dense<0.000000e+00> : vector<8x128xf32>
    %15 = tpu.matmul %12, %14, %cst_12 {dimension_numbers = #tpu.dot_dimension_numbers<[1], [0], [0], [1], [0, 0, 1, 1], [], []>} : vector<8x128xf32>, vector<128x128xf32>, vector<8x128xf32> -> vector<8x128xf32>
    %c0_13 = arith.constant 0 : index
    %c0_14 = arith.constant 0 : index
    %c0_15 = arith.constant 0 : index
    %16 = vector.load %arg5[%c0_13, %c0_14, %c0_15] : memref<1x1x128xf32, #tpu.memory_space<vmem>>, vector<1x1x128xf32>
    %17 = vector.shape_cast %16 : vector<1x1x128xf32> to vector<1x128xf32>
    %18 = vector.broadcast %17 : vector<1x128xf32> to vector<8x128xf32>
    %19 = arith.addf %15, %18 : vector<8x128xf32>
    %20 = arith.truncf %19 : vector<8x128xf32> to vector<8x128xbf16>
    %c0_16 = arith.constant 0 : index
    %c0_17 = arith.constant 0 : index
    %21 = vector.load %arg8[%c0_16, %c0_17] : memref<8x128xbf16, #tpu.memory_space<vmem>>, vector<8x128xbf16>
    tpu.vector_store %arg8[%c0_16, %c0_17], %20 {strides = array<i32>} : memref<8x128xbf16, #tpu.memory_space<vmem>>, vector<8x128xbf16>,
    %cst_18 = arith.constant 0xFF800000 : f32
    %22 = vector.broadcast %cst_18 : f32 to vector<8x1xf32>
    %c0_19 = arith.constant 0 : index
    %c0_20 = arith.constant 0 : index
    %23 = vector.load %arg10[%c0_19, %c0_20] : memref<8x1xf32, #tpu.memory_space<vmem>>, vector<8x1xf32>
    tpu.vector_store %arg10[%c0_19, %c0_20], %22 {strides = array<i32>} : memref<8x1xf32, #tpu.memory_space<vmem>>, vector<8x1xf32>,
    %cst_21 = arith.constant 0.000000e+00 : f32
    %24 = vector.broadcast %cst_21 : f32 to vector<8x1xf32>
    %c0_22 = arith.constant 0 : index
    %c0_23 = arith.constant 0 : index
    %25 = vector.load %arg11[%c0_22, %c0_23] : memref<8x1xf32, #tpu.memory_space<vmem>>, vector<8x1xf32>
    tpu.vector_store %arg11[%c0_22, %c0_23], %24 {strides = array<i32>} : memref<8x1xf32, #tpu.memory_space<vmem>>, vector<8x1xf32>,
    %cst_24 = arith.constant 0.000000e+00 : f32
    %26 = vector.broadcast %cst_24 : f32 to vector<8x128xf32>
    %c0_25 = arith.constant 0 : index
    %c0_26 = arith.constant 0 : index
    %27 = vector.load %arg9[%c0_25, %c0_26] : memref<8x128xf32, #tpu.memory_space<vmem>>, vector<8x128xf32>
    tpu.vector_store %arg9[%c0_25, %c0_26], %26 {strides = array<i32>} : memref<8x128xf32, #tpu.memory_space<vmem>>, vector<8x128xf32>,
    %c0_i32_27 = arith.constant 0 : i32
    %c1_i32 = arith.constant 1 : i32
    %28 = arith.muli %c0_i32_27, %c1_i32 : i32
    %c0_i32_28 = arith.constant 0 : i32
    %29 = arith.addi %c0_i32_28, %28 : i32
    %c8_i32 = arith.constant 8 : i32
    %30 = arith.muli %29, %c8_i32 : i32
    %31 = tpu.assume_multiple %30, 8 : i32
    %c0_29 = arith.constant 0 : index
    %c0_30 = arith.constant 0 : index
    %32 = vector.load %arg8[%c0_29, %c0_30] : memref<8x128xbf16, #tpu.memory_space<vmem>>, vector<8x128xbf16>
    %33 = arith.index_cast %31 : i32 to index
    %c0_31 = arith.constant 0 : index
    %34 = vector.load %arg8[%33, %c0_31] : memref<8x128xbf16, #tpu.memory_space<vmem>>, vector<8x128xbf16>
    %35 = arith.index_cast %31 : i32 to index
    %c0_32 = arith.constant 0 : index
    %36 = vector.load %arg6[%35, %c0_32] : memref<8x128xf32, #tpu.memory_space<vmem>>, vector<8x128xf32>
    %37 = arith.truncf %36 : vector<8x128xf32> to vector<8x128xbf16>
    %cst_33 = arith.constant dense<0.000000e+00> : vector<8x8xf32>
    %38 = tpu.matmul %32, %34, %cst_33 {dimension_numbers = #tpu.dot_dimension_numbers<[1], [1], [0], [0], [0, 0, 1, 0], [], []>} : vector<8x128xbf16>, vector<8x128xbf16>, vector<8x8xf32> -> vector<8x8xf32>
    %c0_34 = arith.constant 0 : index
    %c0_35 = arith.constant 0 : index
    %39 = vector.load %arg10[%c0_34, %c0_35] : memref<8x1xf32, #tpu.memory_space<vmem>>, vector<8x1xf32>
    %cst_36 = arith.constant dense<0xFF800000> : vector<8xf32>
    %40 = vector.multi_reduction <maximumf>, %38, %cst_36 [1] : vector<8x8xf32> to vector<8xf32>
    %41 = vector.shape_cast %40 : vector<8xf32> to vector<8x1xf32>
    %42 = arith.maximumf %39, %41 : vector<8x1xf32>
    %43 = arith.subf %39, %42 : vector<8x1xf32>
    %44 = math.exp %43 : vector<8x1xf32>
    %45 = vector.broadcast %42 : vector<8x1xf32> to vector<8x8xf32>
    %46 = arith.subf %38, %45 : vector<8x8xf32>
    %47 = math.exp %46 : vector<8x8xf32>
    %c0_37 = arith.constant 0 : index
    %c0_38 = arith.constant 0 : index
    %48 = vector.load %arg11[%c0_37, %c0_38] : memref<8x1xf32, #tpu.memory_space<vmem>>, vector<8x1xf32>
    %49 = arith.mulf %44, %48 : vector<8x1xf32>
    %cst_39 = arith.constant dense<0.000000e+00> : vector<8xf32>
    %50 = vector.multi_reduction <add>, %47, %cst_39 [1] : vector<8x8xf32> to vector<8xf32>
    %51 = vector.shape_cast %50 : vector<8xf32> to vector<8x1xf32>
    %52 = arith.addf %49, %51 : vector<8x1xf32>
    %c0_40 = arith.constant 0 : index
    %c0_41 = arith.constant 0 : index
    %53 = vector.load %arg11[%c0_40, %c0_41] : memref<8x1xf32, #tpu.memory_space<vmem>>, vector<8x1xf32>
    tpu.vector_store %arg11[%c0_40, %c0_41], %52 {strides = array<i32>} : memref<8x1xf32, #tpu.memory_space<vmem>>, vector<8x1xf32>,
    %c0_42 = arith.constant 0 : index
    %c0_43 = arith.constant 0 : index
    %54 = vector.load %arg9[%c0_42, %c0_43] : memref<8x128xf32, #tpu.memory_space<vmem>>, vector<8x128xf32>
    %55 = vector.broadcast %44 : vector<8x1xf32> to vector<8x128xf32>
    %56 = arith.mulf %55, %54 : vector<8x128xf32>
    %57 = arith.truncf %47 : vector<8x8xf32> to vector<8x8xbf16>
    %cst_44 = arith.constant dense<0.000000e+00> : vector<8x128xf32>
    %58 = tpu.matmul %57, %37, %cst_44 {dimension_numbers = #tpu.dot_dimension_numbers<[1], [0], [0], [1], [0, 0, 1, 1], [], []>} : vector<8x8xbf16>, vector<8x128xbf16>, vector<8x128xf32> -> vector<8x128xf32>
    %59 = arith.addf %56, %58 : vector<8x128xf32>
    %c0_45 = arith.constant 0 : index
    %c0_46 = arith.constant 0 : index
    %60 = vector.load %arg9[%c0_45, %c0_46] : memref<8x128xf32, #tpu.memory_space<vmem>>, vector<8x128xf32>
    tpu.vector_store %arg9[%c0_45, %c0_46], %59 {strides = array<i32>} : memref<8x128xf32, #tpu.memory_space<vmem>>, vector<8x128xf32>,
    %c0_47 = arith.constant 0 : index
    %c0_48 = arith.constant 0 : index
    %61 = vector.load %arg10[%c0_47, %c0_48] : memref<8x1xf32, #tpu.memory_space<vmem>>, vector<8x1xf32>
    tpu.vector_store %arg10[%c0_47, %c0_48], %42 {strides = array<i32>} : memref<8x1xf32, #tpu.memory_space<vmem>>, vector<8x1xf32>,
    %c1_i32_49 = arith.constant 1 : i32
    %c0_50 = arith.constant 0 : index
    %c0_51 = arith.constant 0 : index
    %62 = vector.load %arg9[%c0_50, %c0_51] : memref<8x128xf32, #tpu.memory_space<vmem>>, vector<8x128xf32>
    %c0_52 = arith.constant 0 : index
    %c0_53 = arith.constant 0 : index
    %63 = vector.load %arg11[%c0_52, %c0_53] : memref<8x1xf32, #tpu.memory_space<vmem>>, vector<8x1xf32>
    %64 = tpu.reciprocal %63 {approx = true} : vector<8x1xf32> -> vector<8x1xf32>
    %65 = vector.broadcast %64 : vector<8x1xf32> to vector<8x128xf32>
    %66 = arith.mulf %62, %65 : vector<8x128xf32>
    %67 = arith.subf %66, %3 : vector<8x128xf32>
    %cst_54 = arith.constant 1.000000e-01 : f32
    %68 = vector.broadcast %cst_54 : f32 to vector<8x128xf32>
    %69 = arith.mulf %68, %67 : vector<8x128xf32>
    %70 = arith.addf %3, %69 : vector<8x128xf32>
    %c0_55 = arith.constant 0 : index
    %c0_56 = arith.constant 0 : index
    %71 = vector.load %arg6[%c0_55, %c0_56] : memref<8x128xf32, #tpu.memory_space<vmem>>, vector<8x128xf32>
    tpu.vector_store %arg6[%c0_55, %c0_56], %70 {strides = array<i32>} : memref<8x128xf32, #tpu.memory_space<vmem>>, vector<8x128xf32>,
    %c0_57 = arith.constant 0 : index
    %c0_58 = arith.constant 0 : index
    %72 = vector.load %arg1[%c0_57, %c0_58] : memref<8x128xf32, #tpu.memory_space<vmem>>, vector<8x128xf32>
    %73 = arith.subf %70, %72 : vector<8x128xf32>
    %74 = arith.mulf %73, %73 : vector<8x128xf32>
    %cst_59 = arith.constant dense<0.000000e+00> : vector<8xf32>
    %75 = vector.multi_reduction <add>, %74, %cst_59 [1] : vector<8x128xf32> to vector<8xf32>
    %76 = vector.shape_cast %75 : vector<8xf32> to vector<8x1xf32>
    %cst_60 = arith.constant dense<0.000000e+00> : vector<1xf32>
    %77 = vector.multi_reduction <add>, %76, %cst_60 [0] : vector<8x1xf32> to vector<1xf32>
    %78 = vector.shape_cast %77 : vector<1xf32> to vector<1x1xf32>
    %79 = arith.truncf %70 : vector<8x128xf32> to vector<8x128xbf16>
    %c0_61 = arith.constant 0 : index
    %c0_62 = arith.constant 0 : index
    %80 = vector.load %arg8[%c0_61, %c0_62] : memref<8x128xbf16, #tpu.memory_space<vmem>>, vector<8x128xbf16>
    tpu.vector_store %arg8[%c0_61, %c0_62], %79 {strides = array<i32>} : memref<8x128xbf16, #tpu.memory_space<vmem>>, vector<8x128xbf16>,
    %81 = arith.extf %79 : vector<8x128xbf16> to vector<8x128xf32>
    %82 = arith.mulf %81, %81 : vector<8x128xf32>
    %cst_63 = arith.constant dense<0.000000e+00> : vector<8xf32>
    %83 = vector.multi_reduction <add>, %82, %cst_63 [1] : vector<8x128xf32> to vector<8xf32>
    %84 = vector.shape_cast %83 : vector<8xf32> to vector<8x1xf32>
    %c0_64 = arith.constant 0 : index
    %c0_65 = arith.constant 0 : index
    %85 = vector.load %arg10[%c0_64, %c0_65] : memref<8x1xf32, #tpu.memory_space<vmem>>, vector<8x1xf32>
    tpu.vector_store %arg10[%c0_64, %c0_65], %84 {strides = array<i32>} : memref<8x1xf32, #tpu.memory_space<vmem>>, vector<8x1xf32>,
    %cst_66 = arith.constant 0.000000e+00 : f32
    %86 = vector.broadcast %cst_66 : f32 to vector<1x1xf32>
    %c0_67 = arith.constant 0 : index
    %c0_68 = arith.constant 0 : index
    %87 = vector.load %arg12[%c0_67, %c0_68] : memref<1x1xf32, #tpu.memory_space<vmem>>, vector<1x1xf32>
    tpu.vector_store %arg12[%c0_67, %c0_68], %86 {strides = array<i32>} : memref<1x1xf32, #tpu.memory_space<vmem>>, vector<1x1xf32>,
    %c0_i32_69 = arith.constant 0 : i32
    %c1_i32_70 = arith.constant 1 : i32
    %88 = arith.muli %c0_i32_69, %c1_i32_70 : i32
    %c0_i32_71 = arith.constant 0 : i32
    %89 = arith.addi %c0_i32_71, %88 : i32
    %c8_i32_72 = arith.constant 8 : i32
    %90 = arith.muli %89, %c8_i32_72 : i32
    %91 = tpu.assume_multiple %90, 8 : i32
    %92 = arith.index_cast %91 : i32 to index
    %c0_73 = arith.constant 0 : index
    %93 = vector.load %arg8[%92, %c0_73] : memref<8x128xbf16, #tpu.memory_space<vmem>>, vector<8x128xbf16>
    %c0_74 = arith.constant 0 : index
    %c0_75 = arith.constant 0 : index
    %94 = vector.load %arg8[%c0_74, %c0_75] : memref<8x128xbf16, #tpu.memory_space<vmem>>, vector<8x128xbf16>
    %cst_76 = arith.constant dense<0.000000e+00> : vector<8x8xf32>
    %95 = tpu.matmul %94, %93, %cst_76 {dimension_numbers = #tpu.dot_dimension_numbers<[1], [1], [0], [0], [0, 0, 1, 0], [], []>} : vector<8x128xbf16>, vector<8x128xbf16>, vector<8x8xf32> -> vector<8x8xf32>
    %96 = arith.extf %93 : vector<8x128xbf16> to vector<8x128xf32>
    %cst_77 = arith.constant 1.000000e+00 : f32
    %97 = vector.broadcast %cst_77 : f32 to vector<1x128xf32>
    %98 = arith.mulf %96, %96 : vector<8x128xf32>
    %cst_78 = arith.constant dense<0.000000e+00> : vector<1x8xf32>
    %99 = tpu.matmul %97, %98, %cst_78 {dimension_numbers = #tpu.dot_dimension_numbers<[1], [1], [0], [0], [0, 0, 1, 0], [], []>} : vector<1x128xf32>, vector<8x128xf32>, vector<1x8xf32> -> vector<1x8xf32>
    %c0_79 = arith.constant 0 : index
    %c0_80 = arith.constant 0 : index
    %100 = vector.load %arg10[%c0_79, %c0_80] : memref<8x1xf32, #tpu.memory_space<vmem>>, vector<8x1xf32>
    %101 = vector.broadcast %100 : vector<8x1xf32> to vector<8x8xf32>
    %102 = vector.broadcast %99 : vector<1x8xf32> to vector<8x8xf32>
    %103 = arith.addf %101, %102 : vector<8x8xf32>
    %cst_81 = arith.constant 2.000000e+00 : f32
    %104 = vector.broadcast %cst_81 : f32 to vector<8x8xf32>
    %105 = arith.mulf %104, %95 : vector<8x8xf32>
    %106 = arith.subf %103, %105 : vector<8x8xf32>
    %cst_82 = arith.constant 0.000000e+00 : f32
    %107 = vector.broadcast %cst_82 : f32 to vector<8x8xf32>
    %108 = arith.maximumf %106, %107 : vector<8x8xf32>
    %109 = math.sqrt %108 : vector<8x8xf32>
    %cst_83 = arith.constant 1.000000e+00 : f32
    %110 = vector.broadcast %cst_83 : f32 to vector<8x8xf32>
    %111 = arith.addf %110, %109 : vector<8x8xf32>
    %112 = math.log %111 : vector<8x8xf32>
    %c0_84 = arith.constant 0 : index
    %c0_85 = arith.constant 0 : index
    %113 = vector.load %arg12[%c0_84, %c0_85] : memref<1x1xf32, #tpu.memory_space<vmem>>, vector<1x1xf32>
    %cst_86 = arith.constant dense<0.000000e+00> : vector<8xf32>
    %114 = vector.multi_reduction <add>, %112, %cst_86 [1] : vector<8x8xf32> to vector<8xf32>
    %115 = vector.shape_cast %114 : vector<8xf32> to vector<8x1xf32>
    %cst_87 = arith.constant dense<0.000000e+00> : vector<1xf32>
    %116 = vector.multi_reduction <add>, %115, %cst_87 [0] : vector<8x1xf32> to vector<1xf32>
    %117 = vector.shape_cast %116 : vector<1xf32> to vector<1x1xf32>
    %118 = arith.addf %113, %117 : vector<1x1xf32>
    %c0_88 = arith.constant 0 : index
    %c0_89 = arith.constant 0 : index
    %119 = vector.load %arg12[%c0_88, %c0_89] : memref<1x1xf32, #tpu.memory_space<vmem>>, vector<1x1xf32>
    tpu.vector_store %arg12[%c0_88, %c0_89], %118 {strides = array<i32>} : memref<1x1xf32, #tpu.memory_space<vmem>>, vector<1x1xf32>,
    %c1_i32_90 = arith.constant 1 : i32
    %c0_91 = arith.constant 0 : index
    %c0_92 = arith.constant 0 : index
    %120 = vector.load %arg13[%c0_91, %c0_92] : memref<1x1xf32, #tpu.memory_space<vmem>>, vector<1x1xf32>
    %cst_93 = arith.constant 3.906250e-03 : f32
    %121 = vector.broadcast %cst_93 : f32 to vector<1x1xf32>
    %122 = arith.mulf %121, %78 : vector<1x1xf32>
    %123 = arith.addf %120, %122 : vector<1x1xf32>
    %c0_94 = arith.constant 0 : index
    %c0_95 = arith.constant 0 : index
    %124 = vector.load %arg12[%c0_94, %c0_95] : memref<1x1xf32, #tpu.memory_space<vmem>>, vector<1x1xf32>
    %cst_96 = arith.constant 1.562500e-02 : f32
    %125 = vector.broadcast %cst_96 : f32 to vector<1x1xf32>
    %126 = arith.mulf %125, %124 : vector<1x1xf32>
    %127 = arith.addf %123, %126 : vector<1x1xf32>
    %c0_97 = arith.constant 0 : index
    %c0_98 = arith.constant 0 : index
    %128 = vector.load %arg13[%c0_97, %c0_98] : memref<1x1xf32, #tpu.memory_space<vmem>>, vector<1x1xf32>
    tpu.vector_store %arg13[%c0_97, %c0_98], %127 {strides = array<i32>} : memref<1x1xf32, #tpu.memory_space<vmem>>, vector<1x1xf32>,
    %c1_i32_99 = arith.constant 1 : i32
    %129 = arith.cmpi eq, %arg0, %c1_i32_99 : i32
    %130 = arith.extui %129 : i1 to i32
    %c0_i32_100 = arith.constant 0 : i32
    %131 = arith.cmpi ne, %130, %c0_i32_100 : i32
    scf.if %131 {
      %c0_101 = arith.constant 0 : index
      %c0_102 = arith.constant 0 : index
      %132 = vector.load %arg13[%c0_101, %c0_102] : memref<1x1xf32, #tpu.memory_space<vmem>>, vector<1x1xf32>
      %c0_103 = arith.constant 0 : index
      %c0_104 = arith.constant 0 : index
      %133 = vector.load %arg7[%c0_103, %c0_104] : memref<1x1xf32, #tpu.memory_space<vmem>>, vector<1x1xf32>
      tpu.vector_store %arg7[%c0_103, %c0_104], %132 {strides = array<i32>} : memref<1x1xf32, #tpu.memory_space<vmem>>, vector<1x1xf32>,
    } else {
    }
    return
  }
  func.func @transform_0(%arg0: i32) -> (i32, i32) {
    %c0_i32 = arith.constant 0 : i32
    %c0_i32_0 = arith.constant 0 : i32
    %c0_i32_1 = arith.constant 0 : i32
    return %c0_i32, %c0_i32_0 : i32, i32
  }
  func.func @transform_1(%arg0: i32) -> (i32, i32, i32) {
    %c0_i32 = arith.constant 0 : i32
    %c0_i32_0 = arith.constant 0 : i32
    %c0_i32_1 = arith.constant 0 : i32
    return %arg0, %c0_i32, %c0_i32_0 : i32, i32, i32
  }
  func.func @transform_2(%arg0: i32) -> (i32, i32, i32) {
    %c0_i32 = arith.constant 0 : i32
    %c0_i32_0 = arith.constant 0 : i32
    %c0_i32_1 = arith.constant 0 : i32
    return %arg0, %c0_i32, %c0_i32_0 : i32, i32, i32
  }
  func.func @transform_3(%arg0: i32) -> (i32, i32, i32) {
    %c0_i32 = arith.constant 0 : i32
    %c0_i32_0 = arith.constant 0 : i32
    %c0_i32_1 = arith.constant 0 : i32
    return %arg0, %c0_i32, %c0_i32_0 : i32, i32, i32
  }
  func.func @transform_4(%arg0: i32) -> (i32, i32, i32) {
    %c0_i32 = arith.constant 0 : i32
    %c0_i32_0 = arith.constant 0 : i32
    %c0_i32_1 = arith.constant 0 : i32
    return %arg0, %c0_i32, %c0_i32_0 : i32, i32, i32
  }
  func.func @transform_5(%arg0: i32) -> (i32, i32) {
    %c0_i32 = arith.constant 0 : i32
    %c0_i32_0 = arith.constant 0 : i32
    %c0_i32_1 = arith.constant 0 : i32
    return %c0_i32, %c0_i32_0 : i32, i32
  }
  func.func @transform_6(%arg0: i32) -> (i32, i32) {
    %c0_i32 = arith.constant 0 : i32
    %c0_i32_0 = arith.constant 0 : i32
    %c0_i32_1 = arith.constant 0 : i32
    return %c0_i32, %c0_i32_0 : i32, i32
  }
}

</mosaic_0001>

<bundles_post_ra>
// kernel: tpu_custom_call.1
= control target key start
LH: loop header
LB: loop body
LE: loop exit
PB: predicated region body
PF: predicated region fallthrough
CT: control target
= control target key end

     0   :  { %12 = vsyncpa [#allocation9], 0  ;;  %s1880_s0 = inlined_call_operand.hbm [shape: f32[8,128], index: 0, kind: input, shape index: {}]   ;;  %s1881_s1 = inlined_call_operand.hbm [shape: f32[2,128,128], index: 1, kind: input, shape index: {}]   ;;  %s1882_s2 = inlined_call_operand.vmem [shape: f32[2,1,128], index: 2, kind: input, shape index: {}]   ;;  %s1883_s3 = inlined_call_operand.hbm [shape: f32[2,128,128], index: 3, kind: input, shape index: {}]   ;;  %s1884_s4 = inlined_call_operand.vmem [shape: f32[2,1,128], index: 4, kind: input, shape index: {}]   ;;  %s1885_s5 = inlined_call_operand.hbm [shape: f32[8,128], index: 5, kind: output, shape index: {0}]   ;;  %s1886_s6 = inlined_call_operand.hbm [shape: f32[1,1], index: 6, kind: output, shape index: {1}]  }
   0x1   :  { %13 = vsyncpa [#allocation12], 0 }
   0x2   :  { %15 = vsyncpa [#allocation12 + $0x1], 0 }
   0x3   :  { %16 = vsyncpa [#allocation10], 0 }
   0x4   :  { %17 = vsyncpa [#allocation16], 0  ;;  %s1526_s21 = smov 0   ;;  %s1528_s22 = smov 0  }
   0x5   :  { %s1530_s23 = smov 0   ;;  %s1532_s24 = smov 0  }
   0x6 LB: > { %s1547_s25 = sadd.s32 1, %s1475_s24   ;;  %s51_s26 = sadd.s32 1, %s1471_s23  ;;  %s1475_s24 = sphi %s1532_s24, %s1904_s24   ;;  %s1471_s23 = sphi %s1530_s23, %s1903_s23   ;;  %s1467_s22 = sphi %s1528_s22, %s1902_s22   ;;  %s1463_s21 = sphi %s1526_s21, %s1901_s21  }
   0x7   : > { %s48_s27 = ssub.s32 %s1475_s24, %s1547_s25  ;;  %p58_p0 = scmp.ne.s32.totalorder %s1471_s23, %s1467_s22 }
   0x8   : > { %p49_p1 = scmp.eq.s32.totalorder %s48_s27, 0  ;;  %p59_p2 = scmp.eq.s32.totalorder %s1475_s24, 0 }
   0x9   : > { %p1227_p3 = scmp.lt.s32.totalorder %s1475_s24, 2  ;;  %s219_s29 = sand.u32 1, %s1475_s24  }
   0xa   : > { %s1557_s28 = scalar_select %p49_p1, %s1471_s23, %s51_s26  }
   0xb   : > { %p60_p4 = por %p59_p2, %p58_p0  ;;  %s221_s30 = sand.u32 1, %s1471_s23  }
   0xc   : > { %s1561_s7 = sshll.u32 %s221_s30, 7  ;;  %s1014_s8 = sshll.u32 %s1475_s24, 11 }
   0xd   : > { %s1569_s11 = scalar_lea.hbm %s1881_s1, %s1014_s8  ;;  %s223_s12 = scalar_lea.vmem [#allocation11], %s1561_s7 }
   0xe   : > { %s230_s13 = sshll.u32 %s223_s12, 4  ;;  %p1572_p5 = pnand %p1227_p3, %p60_p4  ;;  %s1576_s13 = int_to_ptr.vmem [resolvable:$true] %s230_s13 }
   0xf   : > { %s1578_s15 = scalar_lea.sflag [#allocation12], %s219_s29  ;;  %s1289_s16 = scalar_lea.hbm %s1569_s11, 2048 }
  0x10   : > { %p1290_p6 = scmp.ne.s32.totalorder %s1569_s11, %s1289_s16  ;;  %p1291_p7 = pneg %p1572_p5 }
  0x11   : > { %s1294_s19 = scalar_lea.hbm %s1881_s1, 4096  ;;  %p1295_p10 = scmp.lt.u32.totalorder %s1569_s11, %s1881_s1 }
  0x12   : > { %p1292_p8 = pnand %p1291_p7, %p1290_p6  ;;  %p1296_p11 = scmp.lt.u32.totalorder %s1294_s19, %s1289_s16 }
  0x13   : > { %p1298_p13 = scmp.lt.u32.totalorder %s1289_s16, %s1569_s11 }
  0x14   : > { %p1293_p9 = pneg %p1292_p8  ;;  %p1297_p12 = por %p1296_p11, %p1295_p10 }
  0x16   : > { %p1299_p0 = por %p1298_p13, %p1297_p12 }
  0x18   : > { %p1300_p1 = pnand %p1299_p0, %p1293_p9 }
  0x1a   : > { %1303 = shalt.err (!%p1300_p1)
}
  0x1b   : > { %s1304_s27 = scalar_lea.vmem %s1576_s13, 2048  ;;  %s1477_s29 = smov [#allocation11]  }
  0x1c   : > { %p1305_p2 = scmp.ne.s32.totalorder %s1576_s13, %s1304_s27  ;;  %s1309_s30 = sshll.u32 %s1477_s29, 4  ;;  %s1310_s30 = int_to_ptr.vmem [resolvable:$false] %s1309_s30 }
  0x1d   : > { %s1311_s9 = scalar_lea.vmem %s1310_s30, 4096  ;;  %p1312_p6 = scmp.lt.s32.totalorder %s1576_s13, %s1310_s30 }
  0x1e   : > { %p1307_p3 = pnand %p1305_p2, %p1291_p7  ;;  %p1313_p8 = scmp.lt.s32.totalorder %s1311_s9, %s1304_s27 }
  0x20   : > { %p1308_p4 = pneg %p1307_p3  ;;  %p1314_p10 = por %p1313_p8, %p1312_p6 }
  0x22   : > { %p1315_p11 = pnand %p1314_p10, %p1308_p4 }
  0x24   : > { %1318 = shalt.err (!%p1315_p11)
}
  0x25   : > { %s1478_s10 = smov 128   ;;  %s1479_s12 = smov 8  }
  0x26   : > { %1222 = dma.hbm_to_vmem [thread:$0]  (!%p1572_p5), %s1569_s11, 2048, %s1576_s13, %s1578_s15, %s1478_s10, %s1478_s10, %s1479_s12  }
  0x27   : > { %s1614_s18 = scalar_lea.hbm %s1883_s3, %s1014_s8  ;;  %s250_s19 = scalar_lea.vmem [#allocation13], %s1561_s7 }
  0x28   : > { %s257_s20 = sshll.u32 %s250_s19, 4  ;;  %s1618_s26 = sadd.s32 4294967295, %s1475_s24   ;;  %s1632_s20 = int_to_ptr.vmem [resolvable:$true] %s257_s20 }
  0x29   : > { %p64_p9 = scmp.ne.s32.totalorder %s1467_s22, %s1463_s21  ;;  %p1887_p12 = scmp.eq.s32.totalorder %s1618_s26, 0 }
  0x2a   : > { %p990_p13 = scmp.ge.s32.totalorder %s1475_s24, 1  ;;  %p195_p0 = scmp.lt.s32.totalorder %s1475_s24, 3 }
  0x2b   : > { %p1628_p2 = por %p1887_p12, %p64_p9  ;;  %s1480_s11 = smov [#allocation8]  }
  0x2c   : > { %p1634_p3 = pnand %p990_p13, %p195_p0  ;;  %s1638_s21 = sshll.u32 %s1480_s11, 4  ;;  %s209_s21 = int_to_ptr.vmem [resolvable:$true] %s1638_s21 }
  0x2d   : > { %s1891_s8 = scalar_select %p1628_p2, 1, 0 }
  0x2e   : > { %s1892_s7 = scalar_select %p1634_p3, 1, 0 }
  0x2f   : > { %s1319_s24 = scalar_lea.hbm %s1614_s18, 2048  ;;  %s1324_s29 = scalar_lea.hbm %s1883_s3, 4096 }
  0x30   : > { %p1320_p6 = scmp.ne.s32.totalorder %s1614_s18, %s1319_s24  ;;  %p1325_p11 = scmp.lt.u32.totalorder %s1614_s18, %s1883_s3 }
  0x31   : > { %p1326_p9 = scmp.lt.u32.totalorder %s1324_s29, %s1319_s24  ;;  %p1328_p0 = scmp.lt.u32.totalorder %s1319_s24, %s1614_s18 }
  0x32   : > { %p1322_p8 = pnand %p1320_p6, %p1291_p7 }
  0x33   : > { %p1327_p13 = por %p1326_p9, %p1325_p11 }
  0x34   : > { %p1323_p10 = pneg %p1322_p8 }
  0x35   : > { %p1329_p1 = por %p1328_p0, %p1327_p13 }
  0x37   : > { %p1330_p12 = pnand %p1329_p1, %p1323_p10 }
  0x39   : > { %1333 = shalt.err (!%p1330_p12)
}
  0x3a   : > { %s1334_s16 = scalar_lea.vmem %s1632_s20, 2048  ;;  %s1481_s17 = smov [#allocation13]  }
  0x3b   : > { %p1335_p6 = scmp.ne.s32.totalorder %s1632_s20, %s1334_s16  ;;  %s1339_s19 = sshll.u32 %s1481_s17, 4  ;;  %s1340_s19 = int_to_ptr.vmem [resolvable:$false] %s1339_s19 }
  0x3c   : > { %s1341_s11 = scalar_lea.vmem %s1340_s19, 4096  ;;  %p1342_p2 = scmp.lt.s32.totalorder %s1632_s20, %s1340_s19 }
  0x3d   : > { %p1337_p8 = pnand %p1335_p6, %p1291_p7  ;;  %p1343_p11 = scmp.lt.s32.totalorder %s1341_s11, %s1334_s16 }
  0x3f   : > { %p1338_p4 = pneg %p1337_p8  ;;  %p1344_p9 = por %p1343_p11, %p1342_p2 }
  0x41   : > { %p1345_p13 = pnand %p1344_p9, %p1338_p4 }
  0x43   : > { %1348 = shalt.err (!%p1345_p13)
}
  0x44   : > { %1225 = dma.hbm_to_vmem [thread:$0]  (!%p1572_p5), %s1614_s18, 2048, %s1632_s20, %s1578_s15, %s1478_s10, %s1478_s10, %s1479_s12  }
  0x45   : > { %p1893_p7 = scmp.eq.s32.totalorder %s1618_s26, 0  ;;  %p1894_p12 = pneg %p1634_p3 }
  0x46   : > { %s1349_s27 = scalar_lea.hbm %s1880_s0, 128 }
  0x47   : > { %p1675_p1 = pnand %p1894_p12, %p1893_p7  ;;  %p1350_p2 = scmp.ne.s32.totalorder %s1880_s0, %s1349_s27 }
  0x48   : > { %p1356_p0 = scmp.lt.u32.totalorder %s1349_s27, %s1880_s0 }
  0x49   : > { %p1351_p4 = pneg %p1675_p1 }
  0x4b   : > { %p1352_p5 = pnand %p1351_p4, %p1350_p2 }
  0x4d   : > { %p1353_p10 = pneg %p1352_p5 }
  0x4f   : > { %p1358_p6 = pnand %p1356_p0, %p1353_p10 }
  0x51   : > { %1361 = shalt.err (!%p1358_p6)
}
  0x52   : > { %s1362_s12 = scalar_lea.vmem %s209_s21, 128  ;;  %p1370_p13 = scmp.lt.s32.totalorder %s209_s21, %s209_s21 }
  0x53   : > { %p1363_p8 = scmp.ne.s32.totalorder %s209_s21, %s1362_s12  ;;  %p1371_p7 = scmp.lt.s32.totalorder %s1362_s12, %s1362_s12 }
  0x55   : > { %p1365_p11 = pnand %p1363_p8, %p1351_p4  ;;  %p1372_p12 = por %p1371_p7, %p1370_p13 }
  0x57   : > { %p1366_p9 = pneg %p1365_p11 }
  0x59   : > { %p1373_p3 = pnand %p1372_p12, %p1366_p9 }
  0x5b   : > { %1376 = shalt.err (!%p1373_p3)
}
  0x5c   : > { %1218 = dma.hbm_to_vmem [thread:$0]  (!%p1675_p1), %s1880_s0, 128, %s209_s21, [#allocation9]  }
  0x5d   : > { %p1896_p2 = scmp.ne.s32.totalorder %s1892_s7, 0 }
  0x5e   : > { %p1897_p5 = scmp.eq.s32.totalorder (!%p1896_p2), %s1618_s26, 0 }
  0x5f   : > { %275 = sbr.rel (%p1896_p2) target bundleno = 1945 (0x799), region = 40 }
  0x66   : > { %1446 = dma.done.wait (%p1897_p5), [#allocation9], 128   ;;  %p1898_p4 = pmov %p1897_p5 }
  0x67   : > { %s281_s9 = sand.u32 1, %s1618_s26   ;;  %s283_s16 = sand.u32 1, %s1467_s22  }
  0x68   : > { %1448 = vsyncadd (%p1898_p4), [#allocation9], 4294967168  ;;  %s1001_s17 = sshll.u32 %s283_s16, 7  ;;  %s282_s19 = scalar_lea.sflag [#allocation12], %s281_s9 }
  0x69   : > { %s1703_s11 = scalar_lea.vmem [#allocation11], %s1001_s17  ;;  %p1899_p3 = scmp.ne.s32.totalorder %s1891_s8, 0 }
  0x6b   : > { %1450 = dma.done.wait (%p1899_p3), %s282_s19, 4096  }
  0x6c   : > { %1452 = vsyncadd (%p1899_p3), %s282_s19, 4294963200  ;;  %p329_p1 = scmp.lt.s32.totalorder %s1618_s26, 1  ;;  %s1721_s30 = scalar_lea.vmem [#allocation13], %s1001_s17 }
  0x6d   : > { %p1900_p10 = scmp.ne.s32.totalorder %s1618_s26, 0 }
  0x6e   : > { %s1711_s7 = scalar_select %p329_p1, %s1618_s26, 1 }
  0x6f   : > { %339 = sbr.rel (%p1900_p10) target bundleno = 118 (0x76), region = 56  ;;  %v340_v0 = vld [vmem:[#allocation8] sm:$0xff] (!%p1900_p10)  ;;  %vm342_vm0 = vcmask (!%p1900_p10), 0   ;;  %v1482_v1 = vmov (!%p1900_p10), 0.0  }
  0x70   : > { %s331_s13 = scalar_lea.vmem %s1882_s2, %s1711_s7  ;;  %s334_s29 = scalar_lea.vmem %s1884_s4, %s1711_s7  ;;  %341 = vst [vmem:[#allocation14] sm:$0xff] (!%p1900_p10), %v340_v0  ;;  %343 = vst.msk [vmem:[#allocation7] sm:$0x1] (!%p1900_p10), %vm342_vm0, %v1482_v1 }
  0x76 PF: > { %v345_v2 = vld [vmem:[%s1703_s11] sm:$0xff]  ;;  %v346_v3 = vld [vmem:[%s1703_s11 + $0x8] sm:$0xff]  ;;  %v347_v4 = vld [vmem:[%s1703_s11 + $0x10] sm:$0xff]  ;;  %v1483_v5 = vmov 0.0|0.0   ;;  %vm1484_vm1 = vmmov 0   ;;  %v1485_v8 = vmov 0.0  }
  0x77   : > { %1151 = vmatprep.subr.bf16.mxu0 %v1483_v5  ;;  %v1152_v6 = vpack.c.bf16 %v346_v3, %v345_v2  ;;  %v348_v7 = vld [vmem:[%s1703_s11 + $0x18] sm:$0xff]  ;;  %1090 = vmatprep.mubr.msk.f32.mxu0 %vm1484_vm1, %v1485_v8  ;;  %v349_v10 = vld [vmem:[%s1703_s11 + $0x20] sm:$0xff]  ;;  %v350_v11 = vld [vmem:[%s1703_s11 + $0x28] sm:$0xff]  ;;  %vm534_vm2 = vcmask 7168   ;;  %v1486_v1 = vmov -inf   ;;  %vm583_vm3 = vcmask 64512  }
  0x78   : > { %1175 = vmatprep.subr.bf16.mxu1 %v1483_v5  ;;  %1125 = vmatprep.mubr.msk.f32.mxu1 %vm1484_vm1, %v1485_v8  ;;  %v1155_v9 = vpack.c.bf16 %v348_v7, %v347_v4  ;;  %v439_v12 = vld [vmem:[%s1721_s30] sm:$0xff]  ;;  %v440_v13 = vld [vmem:[%s1721_s30 + $0x8] sm:$0xff]  ;;  %v441_v14 = vld [vmem:[%s1721_s30 + $0x10] sm:$0xff]  ;;  %v1158_v16 = vpack.c.bf16 %v350_v11, %v349_v10  ;;  %535 = vst.msk [vmem:[#allocation4] sm:$0xff] %vm534_vm2, %v1486_v1  ;;  %v1487_v7 = vmov 0   ;;  %vm617_vm4 = vcmask 1043456  }
  0x79   : > { %1153 = vmatpush3.bf16.msra.mxu0 %v1152_v6  ;;  %v442_v15 = vld [vmem:[%s1721_s30 + $0x18] sm:$0xff]  ;;  %v1176_v17 = vpack.c.bf16 %v440_v13, %v439_v12  ;;  %v351_v18 = vld [vmem:[%s1703_s11 + $0x30] sm:$0xff]  ;;  %v443_v21 = vld [vmem:[%s1721_s30 + $0x20] sm:$0xff]  ;;  %536 = vst.msk [vmem:[#allocation5] sm:$0xff] %vm534_vm2, %v1485_v8  ;;  %1277 = vset.pattern.permute.xlu0 %v1487_v7  ;;  %vm695_vm5 = vcmask 0   ;;  %p1007_p0 = scmp.ne.s32.totalorder %s1618_s26, 1 }
  0x7a   : > { %1154 = vmatprep.subr.bf16.mxu0 %v1483_v5  ;;  %v352_v19 = vld [vmem:[%s1703_s11 + $0x38] sm:$0xff]  ;;  %v1179_v20 = vpack.c.bf16 %v442_v15, %v441_v14  ;;  %v444_v22 = vld [vmem:[%s1721_s30 + $0x28] sm:$0xff]  ;;  %v353_v24 = vld [vmem:[%s1703_s11 + $0x40] sm:$0xff]  ;;  %1278 = vset.pattern.permute.xlu1 %v1487_v7  ;;  %696 = vst.msk [vmem:[#allocation6] sm:$0x1] %vm695_vm5, %v1485_v8 }
  0x7b   : > { %1177 = vmatpush3.bf16.msra.mxu1 %v1176_v17  ;;  %v1161_v23 = vpack.c.bf16 %v352_v19, %v351_v18  ;;  %v354_v25 = vld [vmem:[%s1703_s11 + $0x48] sm:$0xff]  ;;  %v1182_v26 = vpack.c.bf16 %v444_v22, %v443_v21  ;;  %v445_v27 = vld [vmem:[%s1721_s30 + $0x30] sm:$0xff]  ;;  %v446_v28 = vld [vmem:[%s1721_s30 + $0x38] sm:$0xff] }
  0x7c   : > { %1178 = vmatprep.subr.bf16.mxu1 %v1483_v5  ;;  %v1164_v29 = vpack.c.bf16 %v354_v25, %v353_v24  ;;  %v355_v30 = vld [vmem:[%s1703_s11 + $0x50] sm:$0xff]  ;;  %v356_v31 = vld [vmem:[%s1703_s11 + $0x58] sm:$0xff]  ;;  %v1185_v32 = vpack.c.bf16 %v446_v28, %v445_v27  ;;  %v447_v33 = vld [vmem:[%s1721_s30 + $0x40] sm:$0xff] }
  0x7d   : > { %1156 = vmatpush3.bf16.msra.mxu0 %v1155_v9  ;;  %v448_v34 = vld [vmem:[%s1721_s30 + $0x48] sm:$0xff]  ;;  %v1167_v35 = vpack.c.bf16 %v356_v31, %v355_v30  ;;  %v357_v36 = vld [vmem:[%s1703_s11 + $0x60] sm:$0xff]  ;;  %v449_v39 = vld [vmem:[%s1721_s30 + $0x50] sm:$0xff] }
  0x7e   : > { %1157 = vmatprep.subr.bf16.mxu0 %v1483_v5  ;;  %v358_v37 = vld [vmem:[%s1703_s11 + $0x68] sm:$0xff]  ;;  %v1188_v38 = vpack.c.bf16 %v448_v34, %v447_v33  ;;  %v450_v40 = vld [vmem:[%s1721_s30 + $0x58] sm:$0xff]  ;;  %v359_v42 = vld [vmem:[%s1703_s11 + $0x70] sm:$0xff] }
  0x7f   : > { %1180 = vmatpush3.bf16.msra.mxu1 %v1179_v20  ;;  %v1170_v41 = vpack.c.bf16 %v358_v37, %v357_v36  ;;  %v360_v43 = vld [vmem:[%s1703_s11 + $0x78] sm:$0xff]  ;;  %v1191_v44 = vpack.c.bf16 %v450_v40, %v449_v39  ;;  %v451_v45 = vld [vmem:[%s1721_s30 + $0x60] sm:$0xff]  ;;  %v452_v46 = vld [vmem:[%s1721_s30 + $0x68] sm:$0xff] }
  0x80   : > { %1181 = vmatprep.subr.bf16.mxu1 %v1483_v5  ;;  %v1173_v47 = vpack.c.bf16 %v360_v43, %v359_v42  ;;  %v1194_v48 = vpack.c.bf16 %v452_v46, %v451_v45  ;;  %v1774_v49 = vld [vmem:[#allocation14] sm:$0xff]  ;;  %v453_v50 = vld [vmem:[%s1721_s30 + $0x70] sm:$0xff]  ;;  %v454_v51 = vld [vmem:[%s1721_s30 + $0x78] sm:$0xff] }
  0x81   : > { %1159 = vmatpush3.bf16.msra.mxu0 %v1158_v16  ;;  %v1197_v52 = vpack.c.bf16 %v454_v51, %v453_v50  ;;  %v1004_v53 = vld [vmem:[%s331_s13] ss:$0 sm:$0xff]  ;;  %v582_v9 = vld [vmem:[#allocation4] sm:$0xff]  ;;  %v541_v13 = vpack.c.bf16 %v1774_v49, %v1774_v49  ;;  %v677_v42 = vld [vmem:[#allocation8] sm:$0xff] }
  0x82   : > { %1160 = vmatprep.subr.bf16.mxu0 %v1483_v5  ;;  %v1005_v58 = vld [vmem:[%s334_s29] ss:$0 sm:$0xff] }
  0x83   : > { %1183 = vmatpush3.bf16.msra.mxu1 %v1182_v26  ;;  %v619_v14 = vsel %vm617_vm4, %v541_v13, 0 }
  0x84   : > { %1184 = vmatprep.subr.bf16.mxu1 %v1483_v5 }
  0x85   : > { %1162 = vmatpush3.bf16.msra.mxu0 %v1161_v23  ;;  %v599_v23 = vld [vmem:[#allocation5] sm:$0xff] }
  0x86   : > { %1163 = vmatprep.subr.bf16.mxu0 %v1483_v5 }
  0x87   : > { %1186 = vmatpush3.bf16.msra.mxu1 %v1185_v32 }
  0x88   : > { %1187 = vmatprep.subr.bf16.mxu1 %v1483_v5 }
  0x89   : > { %1165 = vmatpush3.bf16.msra.mxu0 %v1164_v29 }
  0x8a   : > { %1166 = vmatprep.subr.bf16.mxu0 %v1483_v5 }
  0x8b   : > { %1189 = vmatpush3.bf16.msra.mxu1 %v1188_v38 }
  0x8c   : > { %1190 = vmatprep.subr.bf16.mxu1 %v1483_v5 }
  0x8d   : > { %1168 = vmatpush3.bf16.msra.mxu0 %v1167_v35 }
  0x8e   : > { %1169 = vmatprep.subr.bf16.mxu0 %v1483_v5 }
  0x8f   : > { %1192 = vmatpush3.bf16.msra.mxu1 %v1191_v44 }
  0x90   : > { %1193 = vmatprep.subr.bf16.mxu1 %v1483_v5 }
  0x91   : > { %1171 = vmatpush3.bf16.msra.mxu0 %v1170_v41 }
  0x92   : > { %1172 = vmatprep.subr.bf16.mxu0 %v1483_v5 }
  0x93   : > { %1195 = vmatpush3.bf16.msra.mxu1 %v1194_v48 }
  0x94   : > { %1196 = vmatprep.subr.bf16.mxu1 %v1483_v5 }
  0x95   : > { %1174 = vmatpush3.bf16.msra.mxu0 %v1173_v47 }
  0x96   : > { %1128 = vmatprep.subr.bf16.mxu0 %v1485_v8 }
  0x97   : > { %1198 = vmatpush3.bf16.msra.mxu1 %v1197_v52  ;;  %v1488_v52 = vmov 1.0  }
  0x98   : > { %1091 = vmatmul.mubr.f32.vlgmr.msra.gmra.mrb[0].mxu0 %v1774_v49  ;;  %1134 = vmatprep.subr.bf16.mxu1 %v1485_v8 }
  0x99   : > { %1130 = vmatprep.mubr.msk.bf16.mxu0 %vm1484_vm1, %v1485_v8 }
 0x16b   : > { %v434_v54 = vpop.f32.mrb[0].mxu0 }
 0x16c   : > { %v435_v55 = vadd.f32 %v1004_v53, %v434_v54  ;;  %v1092_v56 = vpop.f32.mrb[1].mxu0 }
 0x16e   : > { %v438_v57 = vmax.f32 %v435_v55, 0.0 }
 0x170   : > { %1126 = vmatmul.mubr.f32.vlgmr.msra.gmra.mrb[0].mxu1 %v438_v57 }
 0x171   : > { %1136 = vmatprep.mubr.msk.bf16.mxu1 %vm1484_vm1, %v1485_v8  ;;  %1135 = vmatpush3.bf16.msra.mxu1 %v619_v14 }
 0x172   : > { %1140 = vmatprep.subr.bf16.mxu1 %v1485_v8 }
 0x243   : > { %v528_v59 = vpop.f32.mrb[0].mxu1 }
 0x244   : > { %v529_v60 = vadd.f32 %v1005_v58, %v528_v59  ;;  %v1127_v61 = vpop.f32.mrb[1].mxu1 }
 0x246   : > { %v532_v62 = vpack.c.bf16 %v529_v60, %v529_v60  ;;  %v817_v60 = vlaneseq }
 0x248   : > { %533 = vst [vmem:[#allocation2] sm:$0xf] %v532_v62  ;;  %v818_v61 = vshrl.u32 %v817_v60, 7 }
 0x24a   : > { %v819_v62 = vsub.s32 0, %v818_v61 }
 0x24f   : > { %v539_v63 = vld [vmem:[#allocation2] sm:$0xf] }
 0x250   : > { %1129 = vmatpush3.bf16.xpose.msra.mxu0 %v539_v63  ;;  %v538_v0 = vld [vmem:[#allocation2] sm:$0xf] }
 0x251   : > { %1146 = vmatprep.subr.mxu0 %v1485_v8 }
 0x257   : > { %1131 = vmatmul.mubr.bf16.vlgmr.msra.gmra.mrb[4].mxu0 %v538_v0 }
 0x258   : > { %1148 = vmatprep.mubr.msk.f32.mxu0 %vm1484_vm1, %v1485_v8 }
 0x32a   : > { %v576_v2 = vpop.f32.mrb[4].mxu0 }
 0x32b   : > { %v1132_v3 = vpop.f32.mrb[5].mxu0  ;;  %v584_v4 = vsel %vm583_vm3, %v576_v2, -inf }
 0x32c   : > { %585 = vmax.xlane.f32.xlu0 %v584_v4  ;;  %v579_v5 = vpop.f32.mrb[6].mxu0 }
 0x32d   : > { %v1133_v6 = vpop.f32.mrb[7].mxu0 }
 0x3b9   : > { %v586_v10 = vpop.xlane.xlu0 %585 }
 0x3ba   : > { %v587_v11 = vmax.f32 %v582_v9, %v586_v10 }
 0x3bc   : > { %v588_v12 = vsub.f32 %v582_v9, %v587_v11  ;;  %663 = vst.msk [vmem:[#allocation4] sm:$0xff] %vm534_vm2, %v587_v11  ;;  %593 = vperm.xlu0 %1277, %v587_v11  }
 0x3be   : > { %v589_v21 = vmul.f32 1.442695, %v588_v12 }
 0x43b   : > { %v594_v15 = vpop.permute.xlu0 %593 }
 0x43c   : > { %v596_v16 = vsub.f32 %v576_v2, %v594_v15 }
 0x43e   : > { %v597_v17 = vmul.f32 1.442695, %v596_v16 }
 0x440   : > { %1279 = vpow2.f32 %v597_v17 }
 0x441   : > { %1281 = vpow2.f32 %v589_v21 }
 0x44a   : > { %v1280_v18 = vpop.eup %1279 }
 0x44b   : > { %v601_v19 = vsel %vm583_vm3, %v1280_v18, 0.0  ;;  %v613_v20 = vpack.c.bf16 %v1280_v18, %v1280_v18  ;;  %v1282_v22 = vpop.eup %1281 }
 0x44c   : > { %602 = vadd.xlane.f32.xlu1 %v601_v19  ;;  %v600_v24 = vmul.f32 %v1282_v22, %v599_v23 }
 0x44d   : > { %1137 = vmatmul.mubr.msk.bf16.vlgmr.msra.gmra.mrb[4].mxu1 %vm583_vm3, %v613_v20 }
 0x44e   : > { %1142 = vmatprep.mubr.msk.bf16.mxu1 %vm1484_vm1, %v1485_v8 }
 0x45d   : > { %609 = vperm.xlu1 %1278, %v1282_v22  }
 0x4d9   : > { %v603_v25 = vpop.xlane.xlu1 %602 }
 0x4da   : > { %v604_v26 = vadd.f32 %v603_v25, %v600_v24  ;;  %v835_v25 = vld [vmem:[#allocation6] sm:$0x1] }
 0x4dc   : > { %605 = vst.msk [vmem:[#allocation5] sm:$0xff] %vm534_vm2, %v604_v26 }
 0x4dd   : > { %v610_v33 = vpop.permute.xlu1 %609 }
 0x4de   : > { %v612_v34 = vmul.f32 0.0, %v610_v33 }
 0x4e3   : > { %v665_v27 = vld [vmem:[#allocation5] sm:$0xff] }
 0x4e4   : > { %1283 = vrcp.f32 %v665_v27 }
 0x4ee   : > { %v1284_v28 = vpop.eup %1283 }
 0x4ef   : > { %669 = vperm.xlu1 %1278, %v1284_v28  }
 0x520   : > { %v655_v29 = vpop.f32.mrb[4].mxu1 }
 0x521   : > { %v1138_v30 = vpop.f32.mrb[5].mxu1  ;;  %v661_v35 = vadd.f32 %v655_v29, %v612_v34 }
 0x522   : > { %v658_v31 = vpop.f32.mrb[6].mxu1 }
 0x523   : > { %v1139_v32 = vpop.f32.mrb[7].mxu1  ;;  %v847_v31 = vld [vmem:[#allocation7] sm:$0x1] }
 0x56e   : > { %v670_v36 = vpop.permute.xlu1 %669 }
 0x56f   : > { %v672_v37 = vmul.f32 %v670_v36, %v661_v35 }
 0x571   : > { %v673_v38 = vsub.f32 %v672_v37, %v1774_v49 }
 0x573   : > { %v674_v39 = vmul.f32 0.1, %v673_v38 }
 0x575   : > { %v675_v40 = vadd.f32 %v674_v39, %v1774_v49 }
 0x577   : > { %676 = vst [vmem:[#allocation14] sm:$0xff] %v675_v40  ;;  %v688_v41 = vpack.c.bf16 %v675_v40, %v675_v40  ;;  %v678_v45 = vsub.f32 %v675_v40, %v677_v42 }
 0x579   : > { %v690_v43 = vunpack.c.l.bf16 %v688_v41  ;;  %689 = vst [vmem:[#allocation2] sm:$0xf] %v688_v41  ;;  %v679_v46 = vmul.f32 %v678_v45, %v678_v45 }
 0x57b   : > { %v691_v44 = vmul.f32 %v690_v43, %v690_v43 }
 0x57d   : > { %692 = vadd.xlane.f32.xlu1 %v691_v44 }
 0x580   : > { %v697_v47 = vld [vmem:[#allocation2] sm:$0xf] }
 0x581   : > { %1141 = vmatpush3.bf16.xpose.msra.mxu1 %v697_v47  ;;  %v739_v48 = vunpack.c.l.bf16 %v697_v47  ;;  %680 = vadd.xlane.f32.xlu1 %v679_v46  ;;  %v698_v51 = vld [vmem:[#allocation2] sm:$0xf] }
 0x583   : > { %v740_v50 = vmul.f32 %v739_v48, %v739_v48 }
 0x585   : > { %1147 = vmatpush3.xpose.msra.mxu0 %v740_v50 }
 0x588   : > { %1143 = vmatmul.mubr.bf16.vlgmr.msra.gmra.mrb[8].mxu1 %v698_v51  ;;  %1149 = vmatmul.mubr.f32.vlgmr.msra.gmra.mrb[2].mxu0 %v1488_v52 }
 0x60a   : > { %v693_v49 = vpop.xlane.xlu1 %692 }
 0x60b   : > { %694 = vst.msk [vmem:[#allocation4] sm:$0xff] %vm534_vm2, %v693_v49 }
 0x60e   : > { %v681_v14 = vpop.xlane.xlu1 %680 }
 0x60f   : > { %v682_v15 = vrot.slane %v681_v14, 4 }
 0x611   : > { %v683_v16 = vadd.f32 %v682_v15, %v681_v14 }
 0x612   : > { %v811_v53 = vld [vmem:[#allocation4] sm:$0xff] }
 0x613   : > { %814 = vperm.xlu0 %1277, %v811_v53   ;;  %v684_v19 = vrot.slane %v683_v16, 2 }
 0x615   : > { %v685_v22 = vadd.f32 %v684_v19, %v683_v16 }
 0x617   : > { %v686_v26 = vrot.slane %v685_v22, 1 }
 0x619   : > { %v687_v29 = vadd.f32 %v686_v26, %v685_v22 }
 0x61b   : > { %v848_v30 = vmul.f32 0.00390625, %v687_v29 }
 0x61d   : > { %v849_v33 = vadd.f32 %v848_v30, %v847_v31 }
 0x65b   : > { %v733_v54 = vpop.f32.mrb[8].mxu1  ;;  %v807_v55 = vpop.f32.mrb[2].mxu0 }
 0x65c   : > { %v1144_v56 = vpop.f32.mrb[9].mxu1  ;;  %v1150_v57 = vpop.f32.mrb[3].mxu0  ;;  %v820_v63 = vrot.slane %v807_v55, %v819_v62  ;;  %v822_v1 = vmul.f32 2.0, %v733_v54 }
 0x65d   : > { %v736_v58 = vpop.f32.mrb[10].mxu1 }
 0x65e   : > { %v1145_v59 = vpop.f32.mrb[11].mxu1 }
 0x692   : > { %v815_v0 = vpop.permute.xlu0 %814 }
 0x693   : > { %v821_v2 = vadd.f32 %v820_v63, %v815_v0 }
 0x695   : > { %v823_v3 = vsub.f32 %v821_v2, %v822_v1 }
 0x697   : > { %v824_v4 = vmax.f32 %v823_v3, 0.0 }
 0x699   : > { %1285 = vrsqrt.f32 %v824_v4  ;;  %vm827_vm6 = vcmp.eq.f32.partialorder %v824_v4, inf  ;;  %v830_v8 = vand.u32 2147483648, %v824_v4  ;;  %vm829_vm7 = vcmp.eq.f32.partialorder %v824_v4, 0.0 }
 0x6a3   : > { %v1286_v5 = vpop.eup %1285 }
 0x6a4   : > { %v826_v6 = vmul.f32 %v1286_v5, %v824_v4 }
 0x6a6   : > { %v828_v7 = vsel %vm827_vm6, %v824_v4, %v826_v6 }
 0x6a7   : > { %v831_v9 = vsel %vm829_vm7, %v830_v8, %v828_v7 }
 0x6a8   : > { %v832_v10 = vadd.f32 1.0, %v831_v9 }
 0x6aa   : > { %1287 = vlog2.f32 %v832_v10 }
 0x6b4   : > { %v1288_v11 = vpop.eup %1287 }
 0x6b5   : > { %v834_v12 = vmul.f32 0.6931472, %v1288_v11 }
 0x6b7   : > { %v836_v13 = vsel %vm583_vm3, %v834_v12, 0.0 }
 0x6b8   : > { %837 = vadd.xlane.f32.xlu0 %v836_v13 }
 0x745   : > { %v838_v17 = vpop.xlane.xlu0 %837 }
 0x746   : > { %v839_v18 = vrot.slane %v838_v17, 4 }
 0x748   : > { %v840_v20 = vadd.f32 %v839_v18, %v838_v17 }
 0x74a   : > { %v841_v21 = vrot.slane %v840_v20, 2 }
 0x74c   : > { %v842_v23 = vadd.f32 %v841_v21, %v840_v20 }
 0x74e   : > { %v843_v24 = vrot.slane %v842_v23, 1 }
 0x750   : > { %v844_v27 = vadd.f32 %v843_v24, %v842_v23 }
 0x752   : > { %v845_v28 = vadd.f32 %v844_v27, %v835_v25 }
 0x754   : > { %846 = vst.msk [vmem:[#allocation6] sm:$0x1] %vm695_vm5, %v845_v28 }
 0x75a   : > { %857 = sbr.rel (%p1007_p0) target bundleno = 1897 (0x769), region = 60 }
 0x75b   : > { %v850_v32 = vld [vmem:[#allocation6] sm:$0x1] }
 0x75c   : > { %v851_v34 = vmul.f32 0.015625, %v850_v32 }
 0x75e   : > { %v852_v35 = vadd.f32 %v851_v34, %v849_v33 }
 0x760   : > { %853 = vst.msk [vmem:[#allocation7] sm:$0x1] %vm695_vm5, %v852_v35 }
 0x767   : > { %v858_v36 = vld [vmem:[#allocation7] sm:$0x1] }
 0x768   : > { %859 = vst.msk [vmem:[#allocation15] sm:$0x1] %vm695_vm5, %v858_v36 }
 0x769 PF: > { %p1229_p6 = scmp.eq.s32.totalorder %s1618_s26, 1  ;;  %s1489_s18 = smov [#allocation14]  }
 0x76a   : > { %s867_s20 = sshll.u32 %s1489_s18, 4  ;;  %s1490_s9 = smov [#allocation15]   ;;  %s868_s20 = int_to_ptr.vmem [resolvable:$true] %s867_s20 }
 0x76b   : > { %s878_s16 = sshll.u32 %s1490_s9, 4  ;;  %s1377_s17 = scalar_lea.vmem %s868_s20, 128  ;;  %s879_s16 = int_to_ptr.vmem [resolvable:$true] %s878_s16 }
 0x76c   : > { %p1378_p8 = scmp.ne.s32.totalorder %s868_s20, %s1377_s17  ;;  %p1384_p13 = scmp.lt.s32.totalorder %s868_s20, %s868_s20 }
 0x76d   : > { %p1385_p7 = scmp.lt.s32.totalorder %s1377_s17, %s1377_s17 }
 0x76e   : > { %p1379_p11 = pnand %p1378_p8, %p1229_p6 }
 0x76f   : > { %p1386_p12 = por %p1385_p7, %p1384_p13 }
 0x770   : > { %p1380_p9 = pneg %p1379_p11 }
 0x772   : > { %p1387_p2 = pnand %p1386_p12, %p1380_p9 }
 0x774   : > { %1390 = shalt.err (!%p1387_p2)
}
 0x775   : > { %s1391_s7 = scalar_lea.hbm %s1885_s5, 128 }
 0x776   : > { %p1392_p5 = scmp.ne.s32.totalorder %s1885_s5, %s1391_s7  ;;  %p1397_p1 = scmp.lt.u32.totalorder %s1391_s7, %s1885_s5 }
 0x778   : > { %p1393_p4 = pnand %p1392_p5, %p1229_p6 }
 0x77a   : > { %p1394_p3 = pneg %p1393_p4 }
 0x77c   : > { %p1399_p10 = pnand %p1397_p1, %p1394_p3 }
 0x77e   : > { %1402 = shalt.err (!%p1399_p10)
}
 0x77f   : > { %1208 = dma.vmem_to_hbm [thread:$0]  (%p1229_p6), %s868_s20, 128, %s1885_s5, [#allocation10]  }
 0x780   : > { %s1403_s30 = scalar_lea.vmem %s879_s16, 16  ;;  %s1409_s8 = scalar_lea.vmem %s879_s16, 32 }
 0x781   : > { %p1404_p0 = scmp.ne.s32.totalorder %s879_s16, %s1403_s30  ;;  %p1410_p9 = scmp.lt.s32.totalorder %s879_s16, %s879_s16 }
 0x782   : > { %p1411_p13 = scmp.lt.s32.totalorder %s1409_s8, %s1403_s30 }
 0x783   : > { %p1405_p8 = pnand %p1404_p0, %p1229_p6 }
 0x784   : > { %p1412_p7 = por %p1411_p13, %p1410_p9 }
 0x785   : > { %p1406_p11 = pneg %p1405_p8 }
 0x787   : > { %p1413_p12 = pnand %p1412_p7, %p1406_p11 }
 0x789   : > { %1416 = shalt.err (!%p1413_p12)
}
 0x78a   : > { %s1417_s12 = scalar_lea.hbm %s1886_s6, 16 }
 0x78b   : > { %p1418_p2 = scmp.ne.s32.totalorder %s1886_s6, %s1417_s12  ;;  %p1423_p3 = scmp.lt.u32.totalorder %s1417_s12, %s1886_s6 }
 0x78d   : > { %p1419_p5 = pnand %p1418_p2, %p1229_p6 }
 0x78f   : > { %p1420_p4 = pneg %p1419_p5 }
 0x791   : > { %p1425_p1 = pnand %p1423_p3, %p1420_p4 }
 0x793   : > { %1428 = shalt.err (!%p1425_p1)
}
 0x794   : > { %1210 = dma.vmem_to_hbm [thread:$0]  (%p1229_p6), %s879_s16, 16, %s1886_s6, [#allocation16]  }
 0x795   : > { %1454 = dma.done.wait (%p1229_p6), [#allocation10], 128  }
 0x796   : > { %1456 = vsyncadd (%p1229_p6), [#allocation10], 4294967168 }
 0x797   : > { %1458 = dma.done.wait (%p1229_p6), [#allocation16], 16  }
 0x798   : > { %1460 = vsyncadd (%p1229_p6), [#allocation16], 4294967280 }
 0x799 PF: > { %p20_p10 = scmp.ge.s32.totalorder %s1547_s25, 4   ;;  %s1901_s21 = smov %s1467_s22 }
 0x79a   : > { %s1902_s22 = smov %s1471_s23  ;;  %s1903_s23 = smov %s1557_s28 }
 0x79b   : > { %s1904_s24 = smov %s1547_s25  ;;  %22 = sbr.rel (!%p20_p10) target bundleno = 6 (0x6), region = 115 }
 0x7a2   :  { %895 = vsyncpa [#allocation9], 1 }
 0x7a3   :  { %897 = vsyncpa [#allocation9 + $0x1], 1 }
 0x7a4   :  { %898 = vsyncpa [#allocation12], 1 }
 0x7a5   :  { %900 = vsyncpa [#allocation12 + $0x1], 1 }
 0x7a6   :  { %901 = vsyncpa [#allocation10], 1 }
 0x7a7   :  { %903 = vsyncpa [#allocation10 + $0x1], 1 }
 0x7a8   :  { %904 = vsyncpa [#allocation16], 1 }

</bundles_post_ra>
